<compile_context>
chip_gen: v7x
topology: tpu7x:2x2x1
jax: 0.10.0
libtpu: 0.0.40
codegen_flags: <defaults>
</compile_context>

<pallas_src>
import functools

import jax
import jax.numpy as jnp
from jax.experimental import pallas as pl
from jax.experimental.pallas import tpu as pltpu


# ----------------------------- config -----------------------------------
EMBED_DIM = 96          # Video Swin-T patch-embed channels
FEAT_DIM = 768          # VQAHead in_channels (Swin-T stage-4 width)
HID_DIM = 64            # VQAHead hidden_channels
PATCH = (2, 4, 4)       # PatchEmbed3D kernel / stride
CIN = 3                 # RGB
CK = CIN * PATCH[0] * PATCH[1] * PATCH[2]   # 3*2*4*4 = 96 unfolded patch length

_GELU_C1 = 0.7978845608028654            # sqrt(2/pi)
_GELU_C2 = 0.7978845608028654 * 0.044715


def _gelu_tanh(x):
    # tanh-approximate GELU, reduced-op form (7 VALU ops + 1 EUP tanh):
    #   y = 0.5*x ; out = y + y*tanh(x*(c1 + c2*x^2))
    # Works in whatever dtype x carries (f32 on v5e, bf16 on v6e/v7x).
    x2 = x * x
    u = x * (_GELU_C1 + _GELU_C2 * x2)
    y = 0.5 * x
    return y + y * jnp.tanh(u)


@functools.lru_cache(maxsize=None)
def _act_dtype_for_backend():
    # The (768, T) GELU is the binding VALU stage.  v6e/v7x have bf16 VPU/EUP
    # paths (2 elems per 32-bit lane) -> run it in bf16 there; v5e and older
    # have no bf16 vector path -> keep f32.
    try:
        kind = jax.devices()[0].device_kind.lower()
    except Exception:
        return jnp.float32
    for old in ("v2", "v3", "v4", "v5"):
        if old in kind:
            return jnp.float32
    return jnp.bfloat16


def _choose_tile_p(P):
    # Compute-bound kernel: big token tiles amortize the ~0.35us/grid-step
    # overhead.  Keep >= 2 grid steps so the "parallel" token axis can shard
    # across v7x's two TensorCores.  VMEM at tile 2048 stays well under the
    # 48 MiB limit we request below on every generation.
    for t in (2048, 1024, 512, 256, 128):
        if P >= 2 * t:
            return t
    return 128


# ----------------------------- kernel ------------------------------------
def _evaluator_kernel(xT_ref,               # (CK, T)    bf16  unfolded patches, tokens in lanes
                      w1T_ref, b1_ref,      # (768, CK)  bf16, (768, 1) f32  fused patch-embed+proj
                      whidT_ref, bhid_ref,  # (64, 768)  bf16, (64, 1)  f32  VQAHead.fc_hid
                      wlast_ref, blast_ref, # (64, 1)    f32,  (1, 1)   f32  VQAHead.fc_last
                      out_ref,              # (1, T)     f32   quality scores (lane-dense)
                      *, act_dtype):
    xT = xT_ref[...]

    # Fused patch-embed Conv3d(3->96, k=s=(2,4,4)) + 96->768 backbone projection.
    # (Exact algebraic fold: no nonlinearity between them.)  bf16 MXU, f32 acc.
    h = jnp.dot(w1T_ref[...], xT, preferred_element_type=jnp.float32) + b1_ref[...]

    # Big (768, T) GELU: bf16 on v6e/v7x (binding VALU slot halves), f32 on v5e.
    h = _gelu_tanh(h.astype(act_dtype)).astype(jnp.bfloat16)

    # VQAHead.fc_hid: 1x1x1 Conv3d == per-token linear 768 -> 64, + GELU (f32,
    # tensor is 12x smaller so it is off the critical slot).
    h = jnp.dot(whidT_ref[...], h, preferred_element_type=jnp.float32) + bhid_ref[...]
    h = _gelu_tanh(h)

    # VQAHead.fc_last (64 -> 1): degenerate-N matmul kept off the MXU — VPU
    # multiply + sublane reduce (XLU has slack), producing the lane-dense row.
    out = jnp.sum(h * wlast_ref[...], axis=0, keepdims=True) + blast_ref[...]
    out_ref[...] = out.astype(out_ref.dtype)


def _run_fused(patches_T, p, tile_p):
    ck, P_pad = patches_T.shape
    assert P_pad % tile_p == 0
    num_tiles = P_pad // tile_p

    # Grid-invariant operands (weights/biases): constant block index keeps them
    # resident across grid steps; they are tiny (<0.5 MiB total in bf16).
    inv = lambda shape: pl.BlockSpec(shape, lambda i: (0, 0))

    grid_spec = pltpu.PrefetchScalarGridSpec(
        num_scalar_prefetch=0,
        grid=(num_tiles,),
        in_specs=[
            pl.BlockSpec((ck, tile_p), lambda i: (0, i)),        # patches (tokens in lanes)
            inv((FEAT_DIM, ck)),      inv((FEAT_DIM, 1)),        # fused patch-embed + proj
            inv((HID_DIM, FEAT_DIM)), inv((HID_DIM, 1)),         # fc_hid
            inv((HID_DIM, 1)),        inv((1, 1)),               # fc_last
        ],
        out_specs=pl.BlockSpec((1, tile_p), lambda i: (0, i)),   # lane-dense scores
    )

    # Large tiles need more than v5e's 16 MiB scoped-VMEM default; 48 MiB is
    # safely below physical VMEM on every generation (incl. v7x's 64 MiB).
    vmem_limit = 48 * 1024 * 1024 if tile_p >= 1024 else None

    kernel = functools.partial(_evaluator_kernel, act_dtype=_act_dtype_for_backend())

    return pl.pallas_call(
        kernel,
        out_shape=jax.ShapeDtypeStruct((1, P_pad), jnp.float32),
        grid_spec=grid_spec,
        compiler_params=pltpu.CompilerParams(
            dimension_semantics=("parallel",),
            vmem_limit_bytes=vmem_limit,
        ),
    )(
        patches_T,
        p["w1T"], p["b1"],
        p["whidT"], p["bhid"],
        p["wlast"], p["blast"],
    )


# --------------------------- parameters ----------------------------------
def init_params(key):
    """PyTorch-style parameter layout (row-token, column-channel matmuls)."""
    ks = jax.random.split(key, 4)
    s = 0.02
    return {
        # patch-embed conv stored as (cin*kt*kh*kw, embed_dim) matmul weight
        "w_pe":   s * jax.random.normal(ks[0], (CK, EMBED_DIM), jnp.float32),
        "b_pe":   jnp.zeros((1, EMBED_DIM), jnp.float32),
        "w_proj": s * jax.random.normal(ks[1], (EMBED_DIM, FEAT_DIM), jnp.float32),
        "b_proj": jnp.zeros((1, FEAT_DIM), jnp.float32),
        # VQAHead
        "w_hid":  s * jax.random.normal(ks[2], (FEAT_DIM, HID_DIM), jnp.float32),
        "b_hid":  jnp.zeros((1, HID_DIM), jnp.float32),
        "w_last": s * jax.random.normal(ks[3], (HID_DIM, 1), jnp.float32),
        "b_last": jnp.zeros((1, 1), jnp.float32),
    }


def prepare_kernel_params(params):
    """One-time (model-load) prep, hoisted OUT of the per-call jit path:
    fold patch-embed into the projection (exact) and transpose to the
    channels-major / tokens-in-lanes layout; matmul weights in bf16."""
    w_fused = params["w_pe"] @ params["w_proj"]                       # (CK, 768)
    b_fused = params["b_pe"] @ params["w_proj"] + params["b_proj"]    # (1, 768)
    return {
        "w1T":   jnp.transpose(w_fused).astype(jnp.bfloat16),         # (768, CK)
        "b1":    b_fused.reshape(FEAT_DIM, 1).astype(jnp.float32),    # (768, 1)
        "whidT": jnp.transpose(params["w_hid"]).astype(jnp.bfloat16), # (64, 768)
        "bhid":  params["b_hid"].reshape(HID_DIM, 1).astype(jnp.float32),
        "wlast": params["w_last"].reshape(HID_DIM, 1).astype(jnp.float32),
        "blast": params["b_last"].reshape(1, 1).astype(jnp.float32),
    }


# ----------------------------- forward ------------------------------------
def divide_add_evaluator_forward(vclips, kparams, inference=True):
    """Mirrors DiViDeAddEvaluator.forward: returns a list with one score map.

    vclips:  (N, 3, D, H, W) float32, PyTorch NCDHW convention.
    kparams: output of prepare_kernel_params (computed once at model load).
    returns: [score] with score of shape (N, 1, D//2, H//4, W//4).
    """
    N, C, D, H, W = vclips.shape
    assert C == CIN
    kt, kh, kw = PATCH
    Dp, Hp, Wp = D // kt, H // kh, W // kw
    P = N * Dp * Hp * Wp

    # Cast to bf16 FIRST so the full-video HBM->HBM unfold shuffle writes bf16
    # (halves preprocessing store traffic and the kernel's input DMA).
    x = vclips.astype(jnp.bfloat16)

    # Unfold into non-overlapping (kt,kh,kw) patches, channels-major patch
    # vector (c, kt, kh, kw) down axis 0, tokens (n, d', h', w') along axis 1.
    x = x.reshape(N, C, Dp, kt, Hp, kh, Wp, kw)
    x = jnp.transpose(x, (1, 3, 5, 7, 0, 2, 4, 6))        # C,kt,kh,kw,N,D',H',W'
    patches_T = x.reshape(CK, P)                           # (96, P) bf16

    # Pad the token axis to a multiple of 2*tile_p: even #grid-steps gives a
    # balanced split of the "parallel" axis across v7x's 2 TensorCores.
    tile_p = _choose_tile_p(P)
    pad_unit = 2 * tile_p
    P_pad = ((P + pad_unit - 1) // pad_unit) * pad_unit
    if P_pad != P:
        patches_T = jnp.pad(patches_T, ((0, 0), (0, P_pad - P)))

    score_row = _run_fused(patches_T, kparams, tile_p)     # (1, P_pad) f32

    score = score_row[0, :P].reshape(N, Dp, Hp, Wp, 1)
    score = jnp.transpose(score, (0, 4, 1, 2, 3))          # NCDHW: (N,1,D',H',W')
    return [score]


# -------------------------- pure-JAX reference -----------------------------
def _reference_forward(vclips, params):
    N, C, D, H, W = vclips.shape
    kt, kh, kw = PATCH
    Dp, Hp, Wp = D // kt, H // kh, W // kw
    x = vclips.reshape(N, C, Dp, kt, Hp, kh, Wp, kw)
    x = jnp.transpose(x, (0, 2, 4, 6, 1, 3, 5, 7)).reshape(-1, CK)
    h = x @ params["w_pe"] + params["b_pe"]
    h = _gelu_tanh(h @ params["w_proj"] + params["b_proj"])
    h = _gelu_tanh(h @ params["w_hid"] + params["b_hid"])
    s = h @ params["w_last"] + params["b_last"]
    s = s.reshape(N, Dp, Hp, Wp, 1)
    return jnp.transpose(s, (0, 4, 1, 2, 3))


# ------------------------------ main --------------------------------------
if __name__ == "__main__":
    key = jax.random.PRNGKey(0)
    k_x, k_p = jax.random.split(key)

    # Small shapes: batch=2, 3-channel video, 8 frames, 32x32 spatial.
    vclips = jax.random.normal(k_x, (2, 3, 8, 32, 32), jnp.float32)
    params = init_params(k_p)
    kparams = prepare_kernel_params(params)   # hoisted out of the per-call path

    fwd = jax.jit(functools.partial(divide_add_evaluator_forward, inference=True))
    scores = fwd(vclips, kparams)
    jax.block_until_ready(scores[0])

    assert scores[0].shape == (2, 1, 4, 8, 8), scores[0].shape
    assert bool(jnp.all(jnp.isfinite(scores[0])))

    # Sanity vs f32 reference (expected diffs: bf16 matmul operands, and bf16
    # first GELU on v6e/v7x).
    ref = _reference_forward(vclips, params)
    max_diff = float(jnp.max(jnp.abs(scores[0] - ref)))
    assert max_diff < 2e-3, max_diff

    print("KERNEL_OK")
</pallas_src>

<mosaic_0001>
module attributes {stable_mosaic.version = 11 : i64} {
  func.func @_evaluator_kernel(%arg0: i32, %arg1: memref<96x256xbf16, #tpu.memory_space<vmem>>, %arg2: memref<768x96xbf16, #tpu.memory_space<vmem>>, %arg3: memref<768x1xf32, #tpu.memory_space<vmem>>, %arg4: memref<64x768xbf16, #tpu.memory_space<vmem>>, %arg5: memref<64x1xf32, #tpu.memory_space<vmem>>, %arg6: memref<64x1xf32, #tpu.memory_space<vmem>>, %arg7: memref<1x1xf32, #tpu.memory_space<vmem>>, %arg8: memref<1x256xf32, #tpu.memory_space<vmem>>) attributes {dimension_semantics = [#tpu.dimension_semantics<parallel>], iteration_bounds = array<i64: 2>, scalar_prefetch = 0 : i64, scratch_operands = 0 : i64, tpu.core_type = #tpu.core_type<tc>, window_params = [{transform_indices = @transform_0, window_bounds = array<i64: 96, 256>}, {pipeline_mode = #tpu.pipeline_mode<synchronous>, transform_indices = @transform_1, window_bounds = array<i64: 768, 96>}, {pipeline_mode = #tpu.pipeline_mode<synchronous>, transform_indices = @transform_2, window_bounds = array<i64: 768, 1>}, {pipeline_mode = #tpu.pipeline_mode<synchronous>, transform_indices = @transform_3, window_bounds = array<i64: 64, 768>}, {pipeline_mode = #tpu.pipeline_mode<synchronous>, transform_indices = @transform_4, window_bounds = array<i64: 64, 1>}, {pipeline_mode = #tpu.pipeline_mode<synchronous>, transform_indices = @transform_5, window_bounds = array<i64: 64, 1>}, {pipeline_mode = #tpu.pipeline_mode<synchronous>, transform_indices = @transform_6, window_bounds = array<i64: 1, 1>}, {transform_indices = @transform_7, window_bounds = array<i64: 1, 256>}]} {
    %c0 = arith.constant 0 : index
    %c0_0 = arith.constant 0 : index
    %0 = vector.load %arg1[%c0, %c0_0] : memref<96x256xbf16, #tpu.memory_space<vmem>>, vector<96x256xbf16>
    %c0_1 = arith.constant 0 : index
    %c0_2 = arith.constant 0 : index
    %1 = vector.load %arg2[%c0_1, %c0_2] : memref<768x96xbf16, #tpu.memory_space<vmem>>, vector<768x96xbf16>
    %cst = arith.constant dense<0.000000e+00> : vector<768x256xf32>
    %2 = tpu.matmul %1, %0, %cst {dimension_numbers = #tpu.dot_dimension_numbers<[1], [0], [0], [1], [0, 0, 1, 1], [], []>} : vector<768x96xbf16>, vector<96x256xbf16>, vector<768x256xf32> -> vector<768x256xf32>
    %c0_3 = arith.constant 0 : index
    %c0_4 = arith.constant 0 : index
    %3 = vector.load %arg3[%c0_3, %c0_4] : memref<768x1xf32, #tpu.memory_space<vmem>>, vector<768x1xf32>
    %4 = vector.broadcast %3 : vector<768x1xf32> to vector<768x256xf32>
    %5 = arith.addf %2, %4 : vector<768x256xf32>
    %6 = arith.truncf %5 : vector<768x256xf32> to vector<768x256xbf16>
    %7 = arith.mulf %6, %6 : vector<768x256xbf16>
    %cst_5 = arith.constant 3.564450e-02 : bf16
    %8 = vector.broadcast %cst_5 : bf16 to vector<768x256xbf16>
    %9 = arith.mulf %8, %7 : vector<768x256xbf16>
    %cst_6 = arith.constant 7.968750e-01 : bf16
    %10 = vector.broadcast %cst_6 : bf16 to vector<768x256xbf16>
    %11 = arith.addf %10, %9 : vector<768x256xbf16>
    %12 = arith.mulf %6, %11 : vector<768x256xbf16>
    %cst_7 = arith.constant 5.000000e-01 : bf16
    %13 = vector.broadcast %cst_7 : bf16 to vector<768x256xbf16>
    %14 = arith.mulf %13, %6 : vector<768x256xbf16>
    %15 = math.tanh %12 : vector<768x256xbf16>
    %16 = arith.mulf %14, %15 : vector<768x256xbf16>
    %17 = arith.addf %14, %16 : vector<768x256xbf16>
    %c0_8 = arith.constant 0 : index
    %c0_9 = arith.constant 0 : index
    %18 = vector.load %arg4[%c0_8, %c0_9] : memref<64x768xbf16, #tpu.memory_space<vmem>>, vector<64x768xbf16>
    %cst_10 = arith.constant dense<0.000000e+00> : vector<64x256xf32>
    %19 = tpu.matmul %18, %17, %cst_10 {dimension_numbers = #tpu.dot_dimension_numbers<[1], [0], [0], [1], [0, 0, 1, 1], [], []>} : vector<64x768xbf16>, vector<768x256xbf16>, vector<64x256xf32> -> vector<64x256xf32>
    %c0_11 = arith.constant 0 : index
    %c0_12 = arith.constant 0 : index
    %20 = vector.load %arg5[%c0_11, %c0_12] : memref<64x1xf32, #tpu.memory_space<vmem>>, vector<64x1xf32>
    %21 = vector.broadcast %20 : vector<64x1xf32> to vector<64x256xf32>
    %22 = arith.addf %19, %21 : vector<64x256xf32>
    %23 = arith.mulf %22, %22 : vector<64x256xf32>
    %cst_13 = arith.constant 0.0356774069 : f32
    %24 = vector.broadcast %cst_13 : f32 to vector<64x256xf32>
    %25 = arith.mulf %24, %23 : vector<64x256xf32>
    %cst_14 = arith.constant 0.797884583 : f32
    %26 = vector.broadcast %cst_14 : f32 to vector<64x256xf32>
    %27 = arith.addf %26, %25 : vector<64x256xf32>
    %28 = arith.mulf %22, %27 : vector<64x256xf32>
    %cst_15 = arith.constant 5.000000e-01 : f32
    %29 = vector.broadcast %cst_15 : f32 to vector<64x256xf32>
    %30 = arith.mulf %29, %22 : vector<64x256xf32>
    %31 = math.tanh %28 : vector<64x256xf32>
    %32 = arith.mulf %30, %31 : vector<64x256xf32>
    %33 = arith.addf %30, %32 : vector<64x256xf32>
    %c0_16 = arith.constant 0 : index
    %c0_17 = arith.constant 0 : index
    %34 = vector.load %arg6[%c0_16, %c0_17] : memref<64x1xf32, #tpu.memory_space<vmem>>, vector<64x1xf32>
    %35 = vector.broadcast %34 : vector<64x1xf32> to vector<64x256xf32>
    %36 = arith.mulf %33, %35 : vector<64x256xf32>
    %cst_18 = arith.constant dense<0.000000e+00> : vector<256xf32>
    %37 = vector.multi_reduction <add>, %36, %cst_18 [0] : vector<64x256xf32> to vector<256xf32>
    %38 = vector.shape_cast %37 : vector<256xf32> to vector<1x256xf32>
    %c0_19 = arith.constant 0 : index
    %c0_20 = arith.constant 0 : index
    %39 = vector.load %arg7[%c0_19, %c0_20] : memref<1x1xf32, #tpu.memory_space<vmem>>, vector<1x1xf32>
    %40 = vector.broadcast %39 : vector<1x1xf32> to vector<1x256xf32>
    %41 = arith.addf %38, %40 : vector<1x256xf32>
    %c0_21 = arith.constant 0 : index
    %c0_22 = arith.constant 0 : index
    %42 = vector.load %arg8[%c0_21, %c0_22] : memref<1x256xf32, #tpu.memory_space<vmem>>, vector<1x256xf32>
    tpu.vector_store %arg8[%c0_21, %c0_22], %41 {strides = array<i32>} : memref<1x256xf32, #tpu.memory_space<vmem>>, vector<1x256xf32>,
    return
  }
  func.func @transform_0(%arg0: i32) -> (i32, i32) {
    %c0_i32 = arith.constant 0 : i32
    %c0_i32_0 = arith.constant 0 : i32
    return %c0_i32, %arg0 : i32, i32
  }
  func.func @transform_1(%arg0: i32) -> (i32, i32) {
    %c0_i32 = arith.constant 0 : i32
    %c0_i32_0 = arith.constant 0 : i32
    %c0_i32_1 = arith.constant 0 : i32
    return %c0_i32, %c0_i32_0 : i32, i32
  }
  func.func @transform_2(%arg0: i32) -> (i32, i32) {
    %c0_i32 = arith.constant 0 : i32
    %c0_i32_0 = arith.constant 0 : i32
    %c0_i32_1 = arith.constant 0 : i32
    return %c0_i32, %c0_i32_0 : i32, i32
  }
  func.func @transform_3(%arg0: i32) -> (i32, i32) {
    %c0_i32 = arith.constant 0 : i32
    %c0_i32_0 = arith.constant 0 : i32
    %c0_i32_1 = arith.constant 0 : i32
    return %c0_i32, %c0_i32_0 : i32, i32
  }
  func.func @transform_4(%arg0: i32) -> (i32, i32) {
    %c0_i32 = arith.constant 0 : i32
    %c0_i32_0 = arith.constant 0 : i32
    %c0_i32_1 = arith.constant 0 : i32
    return %c0_i32, %c0_i32_0 : i32, i32
  }
  func.func @transform_5(%arg0: i32) -> (i32, i32) {
    %c0_i32 = arith.constant 0 : i32
    %c0_i32_0 = arith.constant 0 : i32
    %c0_i32_1 = arith.constant 0 : i32
    return %c0_i32, %c0_i32_0 : i32, i32
  }
  func.func @transform_6(%arg0: i32) -> (i32, i32) {
    %c0_i32 = arith.constant 0 : i32
    %c0_i32_0 = arith.constant 0 : i32
    %c0_i32_1 = arith.constant 0 : i32
    return %c0_i32, %c0_i32_0 : i32, i32
  }
  func.func @transform_7(%arg0: i32) -> (i32, i32) {
    %c0_i32 = arith.constant 0 : i32
    %c0_i32_0 = arith.constant 0 : i32
    return %c0_i32, %arg0 : i32, i32
  }
}

</mosaic_0001>

<bundles_post_ra>
// kernel: squeeze.1
= control target key start
LH: loop header
LB: loop body
LE: loop exit
PB: predicated region body
PF: predicated region fallthrough
CT: control target
= control target key end

     0   :  { %s254_s0 = inlined_call_operand.vmem [shape: f32[512], index: 0, kind: input, shape index: {}]   ;;  %s255_s1 = inlined_call_operand.hbm [shape: f32[2,1,4,8,8], index: 1, kind: output, shape index: {}]  }
   0x1   :  { %v5_v0 = vld [vmem:[%s254_s0] sm:$0xf] }
   0x2   :  { %6 = vst [vmem:[#allocation2] sm:$0xf] %v5_v0 }
   0x3   :  { %2 = vsyncpa [#allocation1], 0  ;;  %s181_s0 = smov 120   ;;  %s182_s8 = smov 104   ;;  %vm8_vm0 = vcmask 64512  }
   0x4   :  { %s183_s9 = smov 112   ;;  %s184_s10 = smov 96  }
   0x5   :  { %s185_s11 = smov 88   ;;  %s186_s12 = smov 80  }
   0x6   :  { %s187_s13 = smov 72   ;;  %s188_s14 = smov 64  }
   0x7   :  { %s189_s15 = smov 56   ;;  %s190_s16 = smov 48  }
   0x8   :  { %s191_s17 = smov 40   ;;  %s192_s18 = smov 32  }
   0x9   :  { %v11_v1 = vld [vmem:[#allocation2] sm:$0xf]   ;;  %s193_s19 = smov 24   ;;  %s194_s20 = smov 16  }
   0xa   :  { %v27_v2 = vld [vmem:[#allocation2] sm:$0xf]   ;;  %12 = vrot.lane.b32.xlu0 %v11_v1, %s181_s0  ;;  %s195_s21 = smov 8   ;;  %s196_s22 = smov [#allocation0]  }
   0xb   :  { %28 = vrot.lane.b32.xlu1 %v27_v2, %s182_s8  ;;  %v19_v3 = vld [vmem:[#allocation2] sm:$0xf]   ;;  %s135_s23 = sshll.u32 %s196_s22, 4  ;;  %s136_s23 = int_to_ptr.vmem [resolvable:$true] %s135_s23 }
   0xc   :  { %v35_v4 = vld [vmem:[#allocation2] sm:$0xf]   ;;  %s157_s24 = scalar_lea.vmem %s136_s23, 1024  ;;  %p162_p1 = scmp.lt.s32.totalorder %s136_s23, %s136_s23 }
   0xd   :  { %v43_v5 = vld [vmem:[#allocation2] sm:$0xf]   ;;  %p158_p0 = scmp.ne.s32.totalorder %s136_s23, %s157_s24  ;;  %p163_p2 = scmp.lt.s32.totalorder %s157_s24, %s157_s24 }
   0xe   :  { %20 = vrot.lane.b32.xlu0 %v19_v3, %s183_s9  ;;  %v51_v6 = vld [vmem:[#allocation2] sm:$0xf]  }
   0xf   :  { %36 = vrot.lane.b32.xlu1 %v35_v4, %s184_s10  ;;  %v59_v7 = vld [vmem:[#allocation2] sm:$0xf]   ;;  %p164_p3 = por %p163_p2, %p162_p1 }
  0x10   :  { %v67_v8 = vld [vmem:[#allocation2] sm:$0xf]  }
  0x11   :  { %v75_v9 = vld [vmem:[#allocation2] sm:$0xf]   ;;  %p165_p4 = pnand %p164_p3, %p158_p0 }
  0x12   :  { %44 = vrot.lane.b32.xlu0 %v43_v5, %s185_s11  ;;  %v83_v10 = vld [vmem:[#allocation2] sm:$0xf]  }
  0x13   :  { %52 = vrot.lane.b32.xlu1 %v51_v6, %s186_s12  ;;  %v7_v11 = vld [vmem:[#allocation2] sm:$0xf]  }
  0x14   :  { %9 = vst.msk [vmem:[#allocation0] ss:$16 sm:$0x3] %vm8_vm0, %v7_v11   ;;  %10 = vst.msk [vmem:[#allocation0] ss:$16 sm:$0xc] %vm8_vm0, %v7_v11  }
  0x15   :  { %v91_v12 = vld [vmem:[#allocation2] sm:$0xf]  }
  0x16   :  { %60 = vrot.lane.b32.xlu0 %v59_v7, %s187_s13  ;;  %v99_v13 = vld [vmem:[#allocation2] sm:$0xf]  }
  0x17   :  { %68 = vrot.lane.b32.xlu1 %v67_v8, %s188_s14  ;;  %v107_v14 = vld [vmem:[#allocation2] sm:$0xf]  }
  0x18   :  { %v115_v15 = vld [vmem:[#allocation2] sm:$0xf]  }
  0x19   :  { %v123_v16 = vld [vmem:[#allocation2] sm:$0xf]  }
  0x1a   :  { %76 = vrot.lane.b32.xlu0 %v75_v9, %s189_s15 }
  0x1b   :  { %84 = vrot.lane.b32.xlu1 %v83_v10, %s190_s16 }
  0x1e   :  { %92 = vrot.lane.b32.xlu0 %v91_v12, %s191_s17 }
  0x1f   :  { %100 = vrot.lane.b32.xlu1 %v99_v13, %s192_s18 }
  0x22   :  { %108 = vrot.lane.b32.xlu0 %v107_v14, %s193_s19 }
  0x23   :  { %116 = vrot.lane.b32.xlu1 %v115_v15, %s194_s20 }
  0x26   :  { %124 = vrot.lane.b32.xlu0 %v123_v16, %s195_s21 }
  0x7c   :  { %v13_v17 = vpop.permute.xlu0 %12  }
  0x7d   :  { %v29_v18 = vpop.permute.xlu1 %28   ;;  %16 = vst.msk [vmem:[#allocation0 + $0x1] ss:$16 sm:$0x3] %vm8_vm0, %v13_v17   ;;  %18 = vst.msk [vmem:[#allocation0 + $0x1] ss:$16 sm:$0xc] %vm8_vm0, %v13_v17  }
  0x7e   :  { %32 = vst.msk [vmem:[#allocation0 + $0x3] ss:$16 sm:$0x3] %vm8_vm0, %v29_v18   ;;  %34 = vst.msk [vmem:[#allocation0 + $0x3] ss:$16 sm:$0xc] %vm8_vm0, %v29_v18  }
  0x80   :  { %v21_v19 = vpop.permute.xlu0 %20  }
  0x81   :  { %v37_v20 = vpop.permute.xlu1 %36   ;;  %24 = vst.msk [vmem:[#allocation0 + $0x2] ss:$16 sm:$0x3] %vm8_vm0, %v21_v19   ;;  %26 = vst.msk [vmem:[#allocation0 + $0x2] ss:$16 sm:$0xc] %vm8_vm0, %v21_v19  }
  0x82   :  { %40 = vst.msk [vmem:[#allocation0 + $0x4] ss:$16 sm:$0x3] %vm8_vm0, %v37_v20   ;;  %42 = vst.msk [vmem:[#allocation0 + $0x4] ss:$16 sm:$0xc] %vm8_vm0, %v37_v20  }
  0x84   :  { %v45_v21 = vpop.permute.xlu0 %44  }
  0x85   :  { %v53_v22 = vpop.permute.xlu1 %52   ;;  %48 = vst.msk [vmem:[#allocation0 + $0x5] ss:$16 sm:$0x3] %vm8_vm0, %v45_v21   ;;  %50 = vst.msk [vmem:[#allocation0 + $0x5] ss:$16 sm:$0xc] %vm8_vm0, %v45_v21  }
  0x86   :  { %56 = vst.msk [vmem:[#allocation0 + $0x6] ss:$16 sm:$0x3] %vm8_vm0, %v53_v22   ;;  %58 = vst.msk [vmem:[#allocation0 + $0x6] ss:$16 sm:$0xc] %vm8_vm0, %v53_v22  }
  0x88   :  { %v61_v23 = vpop.permute.xlu0 %60  }
  0x89   :  { %v69_v24 = vpop.permute.xlu1 %68   ;;  %64 = vst.msk [vmem:[#allocation0 + $0x7] ss:$16 sm:$0x3] %vm8_vm0, %v61_v23   ;;  %66 = vst.msk [vmem:[#allocation0 + $0x7] ss:$16 sm:$0xc] %vm8_vm0, %v61_v23  }
  0x8a   :  { %72 = vst.msk [vmem:[#allocation0 + $0x8] ss:$16 sm:$0x3] %vm8_vm0, %v69_v24   ;;  %74 = vst.msk [vmem:[#allocation0 + $0x8] ss:$16 sm:$0xc] %vm8_vm0, %v69_v24  }
  0x8c   :  { %v77_v25 = vpop.permute.xlu0 %76  }
  0x8d   :  { %v85_v26 = vpop.permute.xlu1 %84   ;;  %80 = vst.msk [vmem:[#allocation0 + $0x9] ss:$16 sm:$0x3] %vm8_vm0, %v77_v25   ;;  %82 = vst.msk [vmem:[#allocation0 + $0x9] ss:$16 sm:$0xc] %vm8_vm0, %v77_v25  }
  0x8e   :  { %88 = vst.msk [vmem:[#allocation0 + $0xa] ss:$16 sm:$0x3] %vm8_vm0, %v85_v26   ;;  %90 = vst.msk [vmem:[#allocation0 + $0xa] ss:$16 sm:$0xc] %vm8_vm0, %v85_v26  }
  0x90   :  { %v93_v27 = vpop.permute.xlu0 %92  }
  0x91   :  { %v101_v28 = vpop.permute.xlu1 %100   ;;  %96 = vst.msk [vmem:[#allocation0 + $0xb] ss:$16 sm:$0x3] %vm8_vm0, %v93_v27   ;;  %98 = vst.msk [vmem:[#allocation0 + $0xb] ss:$16 sm:$0xc] %vm8_vm0, %v93_v27  }
  0x92   :  { %104 = vst.msk [vmem:[#allocation0 + $0xc] ss:$16 sm:$0x3] %vm8_vm0, %v101_v28   ;;  %106 = vst.msk [vmem:[#allocation0 + $0xc] ss:$16 sm:$0xc] %vm8_vm0, %v101_v28  }
  0x94   :  { %v109_v29 = vpop.permute.xlu0 %108  }
  0x95   :  { %v117_v30 = vpop.permute.xlu1 %116   ;;  %112 = vst.msk [vmem:[#allocation0 + $0xd] ss:$16 sm:$0x3] %vm8_vm0, %v109_v29   ;;  %114 = vst.msk [vmem:[#allocation0 + $0xd] ss:$16 sm:$0xc] %vm8_vm0, %v109_v29  }
  0x96   :  { %120 = vst.msk [vmem:[#allocation0 + $0xe] ss:$16 sm:$0x3] %vm8_vm0, %v117_v30   ;;  %122 = vst.msk [vmem:[#allocation0 + $0xe] ss:$16 sm:$0xc] %vm8_vm0, %v117_v30  }
  0x98   :  { %v125_v31 = vpop.permute.xlu0 %124  }
  0x99   :  { %128 = vst.msk [vmem:[#allocation0 + $0xf] ss:$16 sm:$0x3] %vm8_vm0, %v125_v31   ;;  %130 = vst.msk [vmem:[#allocation0 + $0xf] ss:$16 sm:$0xc] %vm8_vm0, %v125_v31  }
  0x9a   :  { %168 = shalt.err (!%p165_p4)
}
  0x9b   :  { %s169_s27 = scalar_lea.hbm %s255_s1, 1024 }
  0x9c   :  { %p170_p5 = scmp.ne.s32.totalorder %s255_s1, %s169_s27  ;;  %p173_p6 = scmp.lt.u32.totalorder %s169_s27, %s255_s1 }
  0x9e   :  { %p175_p7 = pnand %p173_p6, %p170_p5 }
  0xa0   :  { %178 = shalt.err (!%p175_p7)
}
  0xa1   :  { %138 = dma.vmem_to_hbm [thread:$0]  %s136_s23, 1024, %s255_s1, [#allocation1]  }
  0xa2   :  { %179 = dma.done.wait [#allocation1], 1024  }
  0xa3   :  { %180 = vsyncadd [#allocation1], 4294966272 }
  0xa4   :  { %140 = vsyncpa [#allocation1], 1 }

</bundles_post_ra>
